<compile_context>
chip_gen: v7x
topology: tpu7x:2x2x1
jax: 0.10.0
libtpu: 0.0.40
codegen_flags: <defaults>
</compile_context>

<pallas_src>
import functools
import math

import jax
import jax.numpy as jnp
from jax import lax
from jax.experimental import pallas as pl
from jax.experimental.pallas import tpu as pltpu


def mlp_kernel(x_ref,
               w1_ref, b1_ref,
               w2_ref, b2_ref,
               w3_ref, b3_ref,
               w4_ref, b4_ref,
               o_ref):
    """One batch tile.  x_ref: [tb, 6]; weights in (folded) [out, in] layout;
    biases as [out, 1] columns; o_ref: [1, tb] lane-dense output."""
    w1 = w1_ref[...]
    cdt = w1.dtype                      # matmul operand dtype (bf16 or f32)
    x = x_ref[...].astype(cdt)          # [tb, 6]

    # Layer 1: A1 @ X^T -> [24, tb]; contraction on the feature axis of both
    # operands (same pattern as q @ k.T), so no wrapper-side transpose of x.
    dn = (((1,), (1,)), ((), ()))
    h = lax.dot_general(w1, x, dn, preferred_element_type=jnp.float32)
    # Sigmoid folded to a single EUP op: wrapper pre-scaled W1/b1 by 0.5 and
    # absorbed 0.5*t+0.5 into layer 2, so only tanh remains here.
    # (On v6e/v7x the tanh could additionally run in bf16; kept f32 so the
    #  same kernel is exact on v5e.)
    h = jnp.tanh(h + b1_ref[...])                                     # [24, tb]

    h = jnp.dot(w2_ref[...], h.astype(cdt),
                preferred_element_type=jnp.float32)                   # [18, tb]
    h = jnp.tanh(h + b2_ref[...])

    h = jnp.dot(w3_ref[...], h.astype(cdt),
                preferred_element_type=jnp.float32)                   # [12, tb]
    h = jnp.maximum(h + b3_ref[...], 0.0)

    h = jnp.dot(w4_ref[...], h.astype(cdt),
                preferred_element_type=jnp.float32)                   # [1, tb]
    o_ref[...] = (h + b4_ref[...]).astype(o_ref.dtype)                # lane-dense store


def _round_up(v, m):
    return ((v + m - 1) // m) * m


def _choose_tb(batch, tb):
    """Clamp the requested lane tile so small batches still yield >=2 grid
    steps (both v7x TensorCores busy); always a multiple of 128."""
    tb = _round_up(max(tb, 128), 128)
    b128 = _round_up(max(batch, 1), 128)
    half = _round_up(max(b128 // 2, 128), 128)
    return min(tb, half)


@functools.partial(jax.jit, static_argnames=("tb", "use_bf16"))
def mlp_forward(x, params, *, tb=8192, use_bf16=True):
    """x: [B, 6] float32 -> [B, 1] float32.

    params: ((w1, b1), ..., (w4, b4)) with w_i in PyTorch layout [out, in] and
    b_i of shape [out].  tb is the batch (lane) tile size; use_bf16 selects
    bf16 matmul operands (f32 accumulation) vs. exact f32.
    """
    B, F = x.shape
    (w1, b1), (w2, b2), (w3, b3), (w4, b4) = params

    # Fold sigmoid(z) = 0.5*tanh(0.5*z) + 0.5 into the parameters (exact math):
    #   t1 = tanh(A1 @ x + c1),  s1 = 0.5*t1 + 0.5
    #   t2 = tanh(A2 @ t1 + c2), s2 = 0.5*t2 + 0.5
    #   r3 = relu(A3 @ t2 + c3)
    #   y  = A4 @ r3 + c4
    a1 = 0.5 * w1
    c1 = 0.5 * b1
    a2 = 0.25 * w2
    c2 = 0.5 * b2 + 0.25 * jnp.sum(w2, axis=1)
    a3 = 0.5 * w3
    c3 = b3 + 0.5 * jnp.sum(w3, axis=1)
    a4 = w4
    c4 = b4

    mm_dtype = jnp.bfloat16 if use_bf16 else jnp.float32
    a1, a2, a3, a4 = (a.astype(mm_dtype) for a in (a1, a2, a3, a4))
    # Biases as f32 [out, 1] columns so they broadcast across lanes in-kernel.
    c1, c2, c3, c4 = (c.reshape(-1, 1).astype(jnp.float32)
                      for c in (c1, c2, c3, c4))

    tb_eff = _choose_tb(B, tb)
    num_tiles = pl.cdiv(B, tb_eff)
    Bp = num_tiles * tb_eff
    xp = x if Bp == B else jnp.pad(x, ((0, Bp - B), (0, 0)))

    # Tiny weights/biases: full-array blocks with a constant index_map -> they
    # stay resident in VMEM across all grid steps (no per-step re-DMA).
    resident = lambda a: pl.BlockSpec(a.shape, lambda i: (0, 0))

    out = pl.pallas_call(
        mlp_kernel,
        out_shape=jax.ShapeDtypeStruct((1, Bp), jnp.float32),
        grid=(num_tiles,),
        in_specs=[
            pl.BlockSpec((tb_eff, F), lambda i: (i, 0)),   # streamed x tiles
            resident(a1), resident(c1),
            resident(a2), resident(c2),
            resident(a3), resident(c3),
            resident(a4), resident(c4),
        ],
        out_specs=pl.BlockSpec((1, tb_eff), lambda i: (0, i)),  # lane-dense out
        compiler_params=pltpu.CompilerParams(
            # Independent batch tiles -> shard grid steps across the two v7x
            # TensorCores (no-op on single-TC v5e/v6e).
            dimension_semantics=("parallel",),
            # ~14 MiB live at tb=8192 (double-buffered lane-padded x is the
            # bulk); 32 MiB fits every generation's physical VMEM and lifts
            # v5e's 16 MiB default scoped limit.
            vmem_limit_bytes=32 * 1024 * 1024,
        ),
    )(xp, a1, c1, a2, c2, a3, c3, a4, c4)

    # Back to the PyTorch-style [B, 1] output (pure reshape, no transpose).
    return out[0, :B].reshape(B, 1)


def init_linear(key, in_features, out_features):
    """PyTorch nn.Linear default init (U[-1/sqrt(in), 1/sqrt(in)]).
    Weight stored [out, in] (PyTorch layout); bias stored [out]."""
    kw, kb = jax.random.split(key)
    bound = 1.0 / math.sqrt(in_features)
    w = jax.random.uniform(kw, (out_features, in_features),
                           minval=-bound, maxval=bound, dtype=jnp.float32)
    b = jax.random.uniform(kb, (out_features,),
                           minval=-bound, maxval=bound, dtype=jnp.float32)
    return w, b


if __name__ == "__main__":
    root = jax.random.PRNGKey(0)
    k_x, k1, k2, k3, k4 = jax.random.split(root, 5)

    params = (
        init_linear(k1, 6, 24),
        init_linear(k2, 24, 18),
        init_linear(k3, 18, 12),
        init_linear(k4, 12, 1),
    )

    B = 200  # not a multiple of the tile -> exercises padding + 2 grid steps
    x = jax.random.normal(k_x, (B, 6), dtype=jnp.float32)

    # Pure-JAX reference (same math as the PyTorch module).
    (w1, b1), (w2, b2), (w3, b3), (w4, b4) = params
    sig = lambda z: 1.0 / (1.0 + jnp.exp(-z))
    h = sig(x @ w1.T + b1)
    h = sig(h @ w2.T + b2)
    h = jnp.maximum(h @ w3.T + b3, 0.0)
    ref = h @ w4.T + b4

    # Default (fast) path: bf16 matmul operands, f32 accumulation/activations.
    out = jax.block_until_ready(mlp_forward(x, params))
    assert out.shape == (B, 1)
    assert jnp.allclose(out, ref, atol=2e-2, rtol=2e-2), "bf16 path mismatch"

    # Exact path: all-f32 matmuls -> tight agreement with the reference.
    out_f32 = jax.block_until_ready(mlp_forward(x, params, use_bf16=False))
    assert jnp.allclose(out_f32, ref, atol=1e-4, rtol=1e-4), "f32 path mismatch"

    print("KERNEL_OK")
</pallas_src>

<mosaic_0001>
module attributes {stable_mosaic.version = 11 : i64} {
  func.func @mlp_kernel(%arg0: i32, %arg1: memref<128x6xf32, #tpu.memory_space<vmem>>, %arg2: memref<24x6xbf16, #tpu.memory_space<vmem>>, %arg3: memref<24x1xf32, #tpu.memory_space<vmem>>, %arg4: memref<18x24xbf16, #tpu.memory_space<vmem>>, %arg5: memref<18x1xf32, #tpu.memory_space<vmem>>, %arg6: memref<12x18xbf16, #tpu.memory_space<vmem>>, %arg7: memref<12x1xf32, #tpu.memory_space<vmem>>, %arg8: memref<1x12xbf16, #tpu.memory_space<vmem>>, %arg9: memref<1x1xf32, #tpu.memory_space<vmem>>, %arg10: memref<1x128xf32, #tpu.memory_space<vmem>>) attributes {dimension_semantics = [#tpu.dimension_semantics<parallel>], iteration_bounds = array<i64: 2>, scalar_prefetch = 0 : i64, scratch_operands = 0 : i64, tpu.core_type = #tpu.core_type<tc>, window_params = [{transform_indices = @transform_0, window_bounds = array<i64: 128, 6>}, {pipeline_mode = #tpu.pipeline_mode<synchronous>, transform_indices = @transform_1, window_bounds = array<i64: 24, 6>}, {pipeline_mode = #tpu.pipeline_mode<synchronous>, transform_indices = @transform_2, window_bounds = array<i64: 24, 1>}, {pipeline_mode = #tpu.pipeline_mode<synchronous>, transform_indices = @transform_3, window_bounds = array<i64: 18, 24>}, {pipeline_mode = #tpu.pipeline_mode<synchronous>, transform_indices = @transform_4, window_bounds = array<i64: 18, 1>}, {pipeline_mode = #tpu.pipeline_mode<synchronous>, transform_indices = @transform_5, window_bounds = array<i64: 12, 18>}, {pipeline_mode = #tpu.pipeline_mode<synchronous>, transform_indices = @transform_6, window_bounds = array<i64: 12, 1>}, {pipeline_mode = #tpu.pipeline_mode<synchronous>, transform_indices = @transform_7, window_bounds = array<i64: 1, 12>}, {pipeline_mode = #tpu.pipeline_mode<synchronous>, transform_indices = @transform_8, window_bounds = array<i64: 1, 1>}, {transform_indices = @transform_9, window_bounds = array<i64: 1, 128>}]} {
    %c0 = arith.constant 0 : index
    %c0_0 = arith.constant 0 : index
    %0 = vector.load %arg2[%c0, %c0_0] : memref<24x6xbf16, #tpu.memory_space<vmem>>, vector<24x6xbf16>
    %c0_1 = arith.constant 0 : index
    %c0_2 = arith.constant 0 : index
    %1 = vector.load %arg1[%c0_1, %c0_2] : memref<128x6xf32, #tpu.memory_space<vmem>>, vector<128x6xf32>
    %2 = arith.truncf %1 : vector<128x6xf32> to vector<128x6xbf16>
    %cst = arith.constant dense<0.000000e+00> : vector<24x128xf32>
    %3 = tpu.matmul %0, %2, %cst {dimension_numbers = #tpu.dot_dimension_numbers<[1], [1], [0], [0], [0, 0, 1, 0], [], []>} : vector<24x6xbf16>, vector<128x6xbf16>, vector<24x128xf32> -> vector<24x128xf32>
    %c0_3 = arith.constant 0 : index
    %c0_4 = arith.constant 0 : index
    %4 = vector.load %arg3[%c0_3, %c0_4] : memref<24x1xf32, #tpu.memory_space<vmem>>, vector<24x1xf32>
    %5 = vector.broadcast %4 : vector<24x1xf32> to vector<24x128xf32>
    %6 = arith.addf %3, %5 : vector<24x128xf32>
    %7 = math.tanh %6 : vector<24x128xf32>
    %c0_5 = arith.constant 0 : index
    %c0_6 = arith.constant 0 : index
    %8 = vector.load %arg4[%c0_5, %c0_6] : memref<18x24xbf16, #tpu.memory_space<vmem>>, vector<18x24xbf16>
    %9 = arith.truncf %7 : vector<24x128xf32> to vector<24x128xbf16>
    %cst_7 = arith.constant dense<0.000000e+00> : vector<18x128xf32>
    %10 = tpu.matmul %8, %9, %cst_7 {dimension_numbers = #tpu.dot_dimension_numbers<[1], [0], [0], [1], [0, 0, 1, 1], [], []>} : vector<18x24xbf16>, vector<24x128xbf16>, vector<18x128xf32> -> vector<18x128xf32>
    %c0_8 = arith.constant 0 : index
    %c0_9 = arith.constant 0 : index
    %11 = vector.load %arg5[%c0_8, %c0_9] : memref<18x1xf32, #tpu.memory_space<vmem>>, vector<18x1xf32>
    %12 = vector.broadcast %11 : vector<18x1xf32> to vector<18x128xf32>
    %13 = arith.addf %10, %12 : vector<18x128xf32>
    %14 = math.tanh %13 : vector<18x128xf32>
    %c0_10 = arith.constant 0 : index
    %c0_11 = arith.constant 0 : index
    %15 = vector.load %arg6[%c0_10, %c0_11] : memref<12x18xbf16, #tpu.memory_space<vmem>>, vector<12x18xbf16>
    %16 = arith.truncf %14 : vector<18x128xf32> to vector<18x128xbf16>
    %cst_12 = arith.constant dense<0.000000e+00> : vector<12x128xf32>
    %17 = tpu.matmul %15, %16, %cst_12 {dimension_numbers = #tpu.dot_dimension_numbers<[1], [0], [0], [1], [0, 0, 1, 1], [], []>} : vector<12x18xbf16>, vector<18x128xbf16>, vector<12x128xf32> -> vector<12x128xf32>
    %c0_13 = arith.constant 0 : index
    %c0_14 = arith.constant 0 : index
    %18 = vector.load %arg7[%c0_13, %c0_14] : memref<12x1xf32, #tpu.memory_space<vmem>>, vector<12x1xf32>
    %19 = vector.broadcast %18 : vector<12x1xf32> to vector<12x128xf32>
    %20 = arith.addf %17, %19 : vector<12x128xf32>
    %cst_15 = arith.constant 0.000000e+00 : f32
    %21 = vector.broadcast %cst_15 : f32 to vector<12x128xf32>
    %22 = arith.maximumf %20, %21 : vector<12x128xf32>
    %c0_16 = arith.constant 0 : index
    %c0_17 = arith.constant 0 : index
    %23 = vector.load %arg8[%c0_16, %c0_17] : memref<1x12xbf16, #tpu.memory_space<vmem>>, vector<1x12xbf16>
    %24 = arith.truncf %22 : vector<12x128xf32> to vector<12x128xbf16>
    %cst_18 = arith.constant dense<0.000000e+00> : vector<1x128xf32>
    %25 = tpu.matmul %23, %24, %cst_18 {dimension_numbers = #tpu.dot_dimension_numbers<[1], [0], [0], [1], [0, 0, 1, 1], [], []>} : vector<1x12xbf16>, vector<12x128xbf16>, vector<1x128xf32> -> vector<1x128xf32>
    %c0_19 = arith.constant 0 : index
    %c0_20 = arith.constant 0 : index
    %26 = vector.load %arg9[%c0_19, %c0_20] : memref<1x1xf32, #tpu.memory_space<vmem>>, vector<1x1xf32>
    %27 = vector.broadcast %26 : vector<1x1xf32> to vector<1x128xf32>
    %28 = arith.addf %25, %27 : vector<1x128xf32>
    %c0_21 = arith.constant 0 : index
    %c0_22 = arith.constant 0 : index
    %29 = vector.load %arg10[%c0_21, %c0_22] : memref<1x128xf32, #tpu.memory_space<vmem>>, vector<1x128xf32>
    tpu.vector_store %arg10[%c0_21, %c0_22], %28 {strides = array<i32>} : memref<1x128xf32, #tpu.memory_space<vmem>>, vector<1x128xf32>,
    return
  }
  func.func @transform_0(%arg0: i32) -> (i32, i32) {
    %c0_i32 = arith.constant 0 : i32
    %c0_i32_0 = arith.constant 0 : i32
    return %arg0, %c0_i32 : i32, i32
  }
  func.func @transform_1(%arg0: i32) -> (i32, i32) {
    %c0_i32 = arith.constant 0 : i32
    %c0_i32_0 = arith.constant 0 : i32
    %c0_i32_1 = arith.constant 0 : i32
    return %c0_i32, %c0_i32_0 : i32, i32
  }
  func.func @transform_2(%arg0: i32) -> (i32, i32) {
    %c0_i32 = arith.constant 0 : i32
    %c0_i32_0 = arith.constant 0 : i32
    %c0_i32_1 = arith.constant 0 : i32
    return %c0_i32, %c0_i32_0 : i32, i32
  }
  func.func @transform_3(%arg0: i32) -> (i32, i32) {
    %c0_i32 = arith.constant 0 : i32
    %c0_i32_0 = arith.constant 0 : i32
    %c0_i32_1 = arith.constant 0 : i32
    return %c0_i32, %c0_i32_0 : i32, i32
  }
  func.func @transform_4(%arg0: i32) -> (i32, i32) {
    %c0_i32 = arith.constant 0 : i32
    %c0_i32_0 = arith.constant 0 : i32
    %c0_i32_1 = arith.constant 0 : i32
    return %c0_i32, %c0_i32_0 : i32, i32
  }
  func.func @transform_5(%arg0: i32) -> (i32, i32) {
    %c0_i32 = arith.constant 0 : i32
    %c0_i32_0 = arith.constant 0 : i32
    %c0_i32_1 = arith.constant 0 : i32
    return %c0_i32, %c0_i32_0 : i32, i32
  }
  func.func @transform_6(%arg0: i32) -> (i32, i32) {
    %c0_i32 = arith.constant 0 : i32
    %c0_i32_0 = arith.constant 0 : i32
    %c0_i32_1 = arith.constant 0 : i32
    return %c0_i32, %c0_i32_0 : i32, i32
  }
  func.func @transform_7(%arg0: i32) -> (i32, i32) {
    %c0_i32 = arith.constant 0 : i32
    %c0_i32_0 = arith.constant 0 : i32
    %c0_i32_1 = arith.constant 0 : i32
    return %c0_i32, %c0_i32_0 : i32, i32
  }
  func.func @transform_8(%arg0: i32) -> (i32, i32) {
    %c0_i32 = arith.constant 0 : i32
    %c0_i32_0 = arith.constant 0 : i32
    %c0_i32_1 = arith.constant 0 : i32
    return %c0_i32, %c0_i32_0 : i32, i32
  }
  func.func @transform_9(%arg0: i32) -> (i32, i32) {
    %c0_i32 = arith.constant 0 : i32
    %c0_i32_0 = arith.constant 0 : i32
    return %c0_i32, %arg0 : i32, i32
  }
}

</mosaic_0001>

<bundles_post_ra>
// kernel: mlp_forward.1
= control target key start
LH: loop header
LB: loop body
LE: loop exit
PB: predicated region body
PF: predicated region fallthrough
CT: control target
= control target key end

     0   :  { %s926_s11 = smov 0   ;;  %s1030_s0 = inlined_call_operand.vmem [shape: f32[256,6], index: 0, kind: input, shape index: {}]   ;;  %s1031_s1 = inlined_call_operand.vmem [shape: bf16[24,6], index: 1, kind: input, shape index: {}]   ;;  %s1032_s2 = inlined_call_operand.vmem [shape: f32[24,1], index: 2, kind: input, shape index: {}]   ;;  %s1033_s3 = inlined_call_operand.vmem [shape: bf16[18,24], index: 3, kind: input, shape index: {}]   ;;  %s1034_s4 = inlined_call_operand.vmem [shape: f32[18,1], index: 4, kind: input, shape index: {}]   ;;  %s1035_s5 = inlined_call_operand.vmem [shape: bf16[12,18], index: 5, kind: input, shape index: {}]   ;;  %s1036_s6 = inlined_call_operand.vmem [shape: f32[12,1], index: 6, kind: input, shape index: {}]   ;;  %s1037_s7 = inlined_call_operand.vmem [shape: bf16[1,12], index: 7, kind: input, shape index: {}]   ;;  %s1038_s8 = inlined_call_operand.<no memory space> [shape: f32[1,1], index: 8, kind: input, shape index: {}]   ;;  %s1039_s9 = inlined_call_operand.vmem [shape: f32[1,256], index: 9, kind: output, shape index: {}]  }
   0x1   :  { %v14_v0 = vstv %s1038_s8 }
   0x2   :  { %15 = vst [vmem:[#allocation2] sm:$0x1] %v14_v0 }
   0x3 LB: > { %s932_s12 = sadd.s32 4294967295, %s868_s11   ;;  %p746_p0 = scmp.ge.s32.totalorder %s868_s11, 1  ;;  %s868_s11 = sphi %s926_s11, %s21_s11  }
   0x4   : > { %p290_p1 = scmp.lt.s32.totalorder %s868_s11, 3 }
   0x6   : > { %p291_p2 = pnand %p746_p0, %p290_p1 }
   0x7   : > { %s747_s13 = sshll.u32 (!%p291_p2), %s932_s12, 4  ;;  %v845_v1 = vld [vmem:[%s1031_s1] sm:$0xff] (!%p291_p2)   ;;  %vm387_vm0 = vcmask (!%p291_p2), 48128   ;;  %v870_v3 = vmov (!%p291_p2), 0   ;;  %v363_v4 = vld [vmem:[%s1032_s2 + $0x10] sm:$0xff] (!%p291_p2)  ;;  %v362_v5 = vld [vmem:[%s1032_s2 + $0x8] sm:$0xff] (!%p291_p2) }
   0x8   : > { %294 = sbr.rel (%p291_p2) target bundleno = 999 (0x3e7), region = 56  ;;  %p325_p3 = scmp.lt.s32.totalorder (!%p291_p2), %s747_s13, 31  ;;  %v361_v2 = vld [vmem:[%s1032_s2] sm:$0xff] (!%p291_p2)  ;;  %797 = vmatprep.mubr.msk.bf16.mxu0 (!%p291_p2), %vm387_vm0, %v845_v1  ;;  %843 = vset.pattern.permute.xlu0 (!%p291_p2), %v870_v3  ;;  %v475_v13 = vld [vmem:[%s1034_s4 + $0x8] sm:$0xff] (!%p291_p2)  ;;  %v476_v15 = vld [vmem:[%s1034_s4 + $0x10] sm:$0x3] (!%p291_p2) }
   0x9   : > { %366 = vperm.xlu0 (!%p291_p2), %843, %v361_v2   ;;  %844 = vset.pattern.permute.xlu1 (!%p291_p2), %v870_v3  ;;  %v474_v6 = vld [vmem:[%s1034_s4] sm:$0xff] (!%p291_p2)  ;;  %v567_v19 = vld [vmem:[%s1036_s6 + $0x8] sm:$0xf] (!%p291_p2)  ;;  %vm500_vm1 = vcmask (!%p291_p2), 195584   ;;  %vm507_vm2 = vcmask (!%p291_p2), 1043456   ;;  %v871_v63 = vmov (!%p291_p2), 0.0  }
   0xa   : > { %376 = vperm.xlu1 (!%p291_p2), %844, %v363_v4   ;;  %v566_v18 = vld [vmem:[%s1036_s6] sm:$0xff] (!%p291_p2)  ;;  %v846_v44 = vld [vmem:[%s1031_s1 + $0x8] ss:$0 sps:$4 sm:$0xff] (!%p291_p2)   ;;  %vm872_vm3 = vmmov (!%p291_p2), 0   ;;  %vm587_vm4 = vcmask (!%p291_p2), 1040384   ;;  %vm583_vm5 = vcmask (!%p291_p2), 146432  }
   0xb   : > { %v636_v22 = vld [vmem:[#allocation2] sm:$0x1] (!%p291_p2)  ;;  %v848_v62 = vld [vmem:[%s1033_s3 + $0x8] ss:$0 sps:$4 sm:$0x11] (!%p291_p2)   ;;  %vm650_vm6 = vcmask (!%p291_p2), 1045504  }
   0xc   : > { %v847_v45 = vld [vmem:[%s1033_s3] sm:$0xff] (!%p291_p2)   ;;  %vm646_vm7 = vcmask (!%p291_p2), 97280   ;;  %p330_p4 = scmp.lt.s32.totalorder (!%p291_p2), %s932_s12, 1 }
   0xd   : > { %371 = vperm.xlu0 (!%p291_p2), %843, %v362_v5   ;;  %805 = vmatprep.mubr.msk.bf16.mxu1 (!%p291_p2), %vm500_vm1, %v847_v45 }
   0xe   : > { %479 = vperm.xlu1 (!%p291_p2), %844, %v474_v6  }
   0xf   : > { %s1041_s13 = smov (!%p325_p3, %s747_s13), 31  ;;  %s1043_s12 = smov (!%p330_p4, %s932_s12), 1 }
  0x10   : > { %s748_s21 = sshll.u32 %s1041_s13, 3  ;;  %s332_s27 = scalar_lea.vmem %s1039_s9, %s1043_s12 }
  0x11   : > { %s956_s26 = scalar_lea.vmem %s1030_s0, %s748_s21  ;;  %484 = vperm.xlu0 %843, %v475_v13  }
  0x12   : > { %v337_v7 = vld [vmem:[%s956_s26] sm:$0xff]  ;;  %v338_v8 = vld [vmem:[%s956_s26 + $0x8] sm:$0xff]  ;;  %v339_v9 = vld [vmem:[%s956_s26 + $0x10] sm:$0xff]  ;;  %489 = vperm.xlu1 %844, %v476_v15  }
  0x13   : > { %v353_v10 = vpack.c.bf16 %v338_v8, %v337_v7  ;;  %v340_v11 = vld [vmem:[%s956_s26 + $0x18] sm:$0xff]  ;;  %v341_v16 = vld [vmem:[%s956_s26 + $0x20] sm:$0xff]  ;;  %v342_v17 = vld [vmem:[%s956_s26 + $0x28] sm:$0xff] }
  0x14   : > { %v354_v12 = vpack.c.bf16 %v340_v11, %v339_v9  ;;  %v355_v21 = vpack.c.bf16 %v342_v17, %v341_v16  ;;  %v343_v23 = vld [vmem:[%s956_s26 + $0x30] sm:$0xff]  ;;  %v344_v24 = vld [vmem:[%s956_s26 + $0x38] sm:$0xff]  ;;  %v345_v27 = vld [vmem:[%s956_s26 + $0x40] sm:$0xff] }
  0x15   : > { %823 = vmatprep.subr.msk.bf16.mxu0 %vm387_vm0, %v353_v10  ;;  %v395_v14 = vsel %vm387_vm0, %v353_v10, 0  ;;  %570 = vperm.xlu0 %843, %v566_v18   ;;  %v356_v26 = vpack.c.bf16 %v344_v24, %v343_v23  ;;  %v346_v28 = vld [vmem:[%s956_s26 + $0x48] sm:$0xff]  ;;  %v347_v31 = vld [vmem:[%s956_s26 + $0x50] sm:$0xff]  ;;  %v348_v32 = vld [vmem:[%s956_s26 + $0x58] sm:$0xff] }
  0x16   : > { %782 = vmatpush3.bf16.xpose.msra.mxu0 %v395_v14  ;;  %v398_v20 = vsel %vm387_vm0, %v354_v12, 0  ;;  %575 = vperm.xlu1 %844, %v567_v19   ;;  %v401_v25 = vsel %vm387_vm0, %v355_v21, 0  ;;  %v357_v30 = vpack.c.bf16 %v346_v28, %v345_v27  ;;  %v358_v34 = vpack.c.bf16 %v348_v32, %v347_v31  ;;  %v349_v35 = vld [vmem:[%s956_s26 + $0x60] sm:$0xff]  ;;  %v350_v36 = vld [vmem:[%s956_s26 + $0x68] sm:$0xff]  ;;  %v351_v39 = vld [vmem:[%s956_s26 + $0x70] sm:$0xff] }
  0x17   : > { %824 = vmatprep.subr.msk.bf16.mxu0 %vm387_vm0, %v354_v12  ;;  %v404_v29 = vsel %vm387_vm0, %v356_v26, 0  ;;  %v359_v38 = vpack.c.bf16 %v350_v36, %v349_v35  ;;  %v352_v40 = vld [vmem:[%s956_s26 + $0x78] sm:$0xff]  ;;  %v849_v16 = vld [vmem:[%s1035_s5] sm:$0x3f]  }
  0x18   : > { %v407_v33 = vsel %vm387_vm0, %v357_v30, 0  ;;  %v410_v37 = vsel %vm387_vm0, %v358_v34, 0  ;;  %v360_v42 = vpack.c.bf16 %v352_v40, %v351_v39 }
  0x19   : > { %639 = vperm.xlu0 %843, %v636_v22   ;;  %v413_v41 = vsel %vm387_vm0, %v359_v38, 0 }
  0x1a   : > { %v416_v43 = vsel %vm387_vm0, %v360_v42, 0 }
  0x1e   : > { %784 = vmatpush3.bf16.xpose.msra.mxu0 %v398_v20 }
  0x1f   : > { %825 = vmatprep.subr.msk.bf16.mxu0 %vm387_vm0, %v355_v21 }
  0x26   : > { %786 = vmatpush3.bf16.xpose.msra.mxu0 %v401_v25 }
  0x27   : > { %826 = vmatprep.subr.msk.bf16.mxu0 %vm387_vm0, %v356_v26 }
  0x2e   : > { %788 = vmatpush3.bf16.xpose.msra.mxu0 %v404_v29  ;;  %v634_v29 = vld [vmem:[%s1037_s7] sm:$0x1] }
  0x2f   : > { %827 = vmatprep.subr.msk.bf16.mxu0 %vm387_vm0, %v357_v30  ;;  %v642_v30 = vlaneseq }
  0x31   : > { %v643_v31 = vshrl.u32 %v642_v30, 7 }
  0x33   : > { %v644_v32 = vsub.s32 0, %v643_v31 }
  0x36   : > { %790 = vmatpush3.bf16.xpose.msra.mxu0 %v407_v33 }
  0x37   : > { %828 = vmatprep.subr.msk.bf16.mxu0 %vm387_vm0, %v358_v34 }
  0x3e   : > { %792 = vmatpush3.bf16.xpose.msra.mxu0 %v410_v37 }
  0x3f   : > { %829 = vmatprep.subr.msk.bf16.mxu0 %vm387_vm0, %v359_v38 }
  0x46   : > { %794 = vmatpush3.bf16.xpose.msra.mxu0 %v413_v41 }
  0x47   : > { %830 = vmatprep.subr.msk.bf16.mxu0 %vm387_vm0, %v360_v42 }
  0x4e   : > { %796 = vmatpush3.bf16.xpose.msra.mxu0 %v416_v43 }
  0x55   : > { %798 = vmatmul.mubr.msk.bf16.vlgmr.msra.gmra.mrb[0].mxu0 %vm387_vm0, %v846_v44 }
  0x88   : > { %v367_v46 = vpop.permute.xlu0 %366 }
  0x89   : > { %v377_v47 = vpop.permute.xlu1 %376 }
  0x8c   : > { %v372_v53 = vpop.permute.xlu0 %371 }
  0x8d   : > { %v480_v0 = vpop.permute.xlu1 %479 }
  0x90   : > { %v485_v7 = vpop.permute.xlu0 %484 }
  0x91   : > { %v490_v1 = vpop.permute.xlu1 %489 }
  0x94   : > { %v571_v17 = vpop.permute.xlu0 %570 }
  0x95   : > { %v576_v21 = vpop.permute.xlu1 %575 }
  0x98   : > { %v640_v33 = vpop.permute.xlu0 %639 }
  0x99   : > { %v645_v34 = vrot.slane %v640_v33, %v644_v32 }
 0x128   : > { %v799_v48 = vpop.f32.mrb[0].mxu0 }
 0x129   : > { %v461_v49 = vadd.f32 %v799_v48, %v377_v47  ;;  %v452_v50 = vpop.f32.mrb[1].mxu0 }
 0x12a   : > { %v453_v51 = vadd.f32 %v452_v50, %v367_v46  ;;  %v800_v52 = vpop.f32.mrb[2].mxu0 }
 0x12b   : > { %v455_v54 = vpop.f32.mrb[3].mxu0  ;;  %850 = vtanh.f32 %v461_v49 }
 0x12c   : > { %v456_v55 = vadd.f32 %v455_v54, %v372_v53  ;;  %852 = vtanh.f32 %v453_v51 }
 0x12e   : > { %854 = vtanh.f32 %v456_v55 }
 0x135   : > { %v851_v56 = vpop.eup %850 }
 0x136   : > { %v853_v57 = vpop.eup %852  ;;  %v473_v60 = vpack.c.bf16 %v851_v56, %v851_v56 }
 0x138   : > { %v855_v58 = vpop.eup %854  ;;  %v509_v61 = vsel %vm507_vm2, %v473_v60, 0 }
 0x139   : > { %v472_v59 = vpack.c.bf16 %v855_v58, %v853_v57 }
 0x13b   : > { %801 = vmatprep.subr.bf16.mxu1 %v472_v59 }
 0x13c   : > { %802 = vmatpush3.bf16.msra.mxu1 %v472_v59 }
 0x13d   : > { %831 = vmatprep.subr.msk.bf16.mxu1 %vm507_vm2, %v473_v60 }
 0x140   : > { %804 = vmatpush3.bf16.msra.mxu1 %v509_v61 }
 0x141   : > { %809 = vmatprep.subr.bf16.mxu1 %v871_v63 }
 0x143   : > { %806 = vmatmul.mubr.msk.bf16.vlgmr.msra.gmra.mrb[0].mxu1 %vm500_vm1, %v848_v62 }
 0x144   : > { %813 = vmatprep.mubr.msk.bf16.mxu1 %vm872_vm3, %v871_v63 }
 0x216   : > { %v807_v2 = vpop.f32.mrb[0].mxu1 }
 0x217   : > { %v554_v3 = vadd.f32 %v807_v2, %v490_v1  ;;  %v545_v4 = vpop.f32.mrb[1].mxu1 }
 0x218   : > { %v546_v5 = vadd.f32 %v545_v4, %v480_v0  ;;  %v808_v6 = vpop.f32.mrb[2].mxu1 }
 0x219   : > { %v548_v8 = vpop.f32.mrb[3].mxu1  ;;  %856 = vtanh.f32 %v554_v3 }
 0x21a   : > { %v549_v9 = vadd.f32 %v548_v8, %v485_v7  ;;  %858 = vtanh.f32 %v546_v5 }
 0x21c   : > { %860 = vtanh.f32 %v549_v9 }
 0x223   : > { %v857_v10 = vpop.eup %856 }
 0x224   : > { %v859_v11 = vpop.eup %858  ;;  %v565_v14 = vpack.c.bf16 %v857_v10, %v857_v10 }
 0x226   : > { %v861_v12 = vpop.eup %860  ;;  %v589_v15 = vsel %vm587_vm4, %v565_v14, 0 }
 0x227   : > { %v564_v13 = vpack.c.bf16 %v861_v12, %v859_v11 }
 0x229   : > { %810 = vmatpush3.bf16.msra.mxu1 %v564_v13 }
 0x22a   : > { %811 = vmatprep.subr.bf16.mxu1 %v871_v63 }
 0x22d   : > { %812 = vmatpush3.bf16.msra.mxu1 %v589_v15 }
 0x22e   : > { %817 = vmatprep.subr.bf16.mxu1 %v871_v63 }
 0x230   : > { %814 = vmatmul.mubr.msk.bf16.vlgmr.msra.gmra.mrb[4].mxu1 %vm583_vm5, %v849_v16 }
 0x231   : > { %819 = vmatprep.mubr.msk.bf16.mxu1 %vm872_vm3, %v871_v63 }
 0x303   : > { %v625_v18 = vpop.f32.mrb[4].mxu1 }
 0x304   : > { %v626_v19 = vadd.f32 %v625_v18, %v571_v17  ;;  %v815_v20 = vpop.f32.mrb[5].mxu1 }
 0x305   : > { %v628_v22 = vpop.f32.mrb[6].mxu1 }
 0x306   : > { %v629_v23 = vadd.f32 %v628_v22, %v576_v21  ;;  %v816_v24 = vpop.f32.mrb[7].mxu1  ;;  %v632_v25 = vmax.f32 %v626_v19, 0.0 }
 0x308   : > { %v633_v26 = vmax.f32 %v629_v23, 0.0 }
 0x30a   : > { %v635_v27 = vpack.c.bf16 %v633_v26, %v632_v25 }
 0x30c   : > { %v652_v28 = vsel %vm650_vm6, %v635_v27, 0 }
 0x30d   : > { %818 = vmatpush3.bf16.msra.mxu1 %v652_v28 }
 0x310   : > { %820 = vmatmul.mubr.msk.bf16.vlgmr.msra.gmra.mrb[8].mxu1 %vm646_vm7, %v634_v29 }
 0x3e3   : > { %v688_v35 = vpop.f32.mrb[8].mxu1 }
 0x3e4   : > { %v689_v36 = vadd.f32 %v688_v35, %v645_v34  ;;  %v821_v37 = vpop.f32.mrb[9].mxu1 }
 0x3e5   : > { %v691_v38 = vpop.f32.mrb[10].mxu1 }
 0x3e6   : > { %694 = vst [vmem:[%s332_s27] sm:$0x1] %v689_v36  ;;  %v822_v39 = vpop.f32.mrb[11].mxu1 }
 0x3e7 PF: > { %s21_s11 = sadd.s32 1, %s868_s11  }
 0x3e8   : > { %p18_p5 = scmp.ge.s32.totalorder %s21_s11, 4  }
 0x3ea   :  { %20 = sbr.rel (!%p18_p5) target bundleno = 3 (0x3), region = 86 }

</bundles_post_ra>
